<compile_context>
chip_gen: v7x
topology: tpu7x:2x2x1
jax: 0.10.0
libtpu: 0.0.40
codegen_flags: <defaults>
</compile_context>

<pallas_src>
import functools

import jax
import jax.numpy as jnp
from jax import lax
from jax.experimental import pallas as pl
from jax.experimental.pallas import tpu as pltpu

_SMEM_SPEC = pl.BlockSpec(memory_space=pltpu.MemorySpace.SMEM)


def _began_step_kernel(in_ref, out_ref, *, lambda_k, gamma, update_k):
    """Single BEGAN step. Everything lives in SMEM (scalar-ALU path only).

    in_ref  : SMEM f32[3] = [k, real_dloss, fake_dloss]
    out_ref : SMEM f32[2] = [new_k (or passthrough k), convergence]
    """
    k = in_ref[0]
    real = in_ref[1]
    fake = in_ref[2]

    diff = gamma * real - fake
    convergence = real + jnp.abs(diff)
    if update_k:  # static flag: the update path compiles away entirely when False
        k = jnp.clip(k + lambda_k * diff, 0.0, 1.0)

    out_ref[0] = k
    out_ref[1] = convergence


def _began_seq_kernel(k0_ref, real_ref, fake_ref, k_out_ref, conv_ref,
                      *, lambda_k, gamma, update_k, n_steps):
    """Whole recurrence in ONE launch: in-kernel fori_loop over n_steps.

    k0_ref    : SMEM f32[1]        initial k
    real_ref  : SMEM f32[n_steps]  real_dloss per step
    fake_ref  : SMEM f32[n_steps]  fake_dloss per step
    k_out_ref : SMEM f32[1]        final k
    conv_ref  : SMEM f32[n_steps]  convergence per step
    """
    def body(i, k):
        real = real_ref[i]
        fake = fake_ref[i]
        diff = gamma * real - fake
        conv_ref[i] = real + jnp.abs(diff)
        if update_k:  # static
            k = jnp.clip(k + lambda_k * diff, 0.0, 1.0)
        return k

    k_out_ref[0] = lax.fori_loop(0, n_steps, body, k0_ref[0])


def _make_began_step(lambda_k, gamma, update_k):
    kernel = functools.partial(
        _began_step_kernel,
        lambda_k=float(lambda_k), gamma=float(gamma), update_k=bool(update_k))
    call = pl.pallas_call(
        kernel,
        out_shape=jax.ShapeDtypeStruct((2,), jnp.float32),  # [k, convergence]
        in_specs=[_SMEM_SPEC],
        out_specs=_SMEM_SPEC,
        cost_estimate=pl.CostEstimate(flops=6, transcendentals=0,
                                      bytes_accessed=20),
    )

    @jax.jit
    def step(k, real_dloss, fake_dloss):
        packed = jnp.stack([
            jnp.asarray(k, jnp.float32).reshape(()),
            jnp.asarray(real_dloss, jnp.float32).reshape(()),
            jnp.asarray(fake_dloss, jnp.float32).reshape(()),
        ])
        out = call(packed)
        return out[0], out[1]

    return step


def _make_began_sequence(lambda_k, gamma, update_k, n_steps):
    n_steps = int(n_steps)
    kernel = functools.partial(
        _began_seq_kernel,
        lambda_k=float(lambda_k), gamma=float(gamma),
        update_k=bool(update_k), n_steps=n_steps)
    call = pl.pallas_call(
        kernel,
        out_shape=(jax.ShapeDtypeStruct((1,), jnp.float32),        # final k
                   jax.ShapeDtypeStruct((n_steps,), jnp.float32)),  # convergences
        in_specs=[_SMEM_SPEC, _SMEM_SPEC, _SMEM_SPEC],
        out_specs=(_SMEM_SPEC, _SMEM_SPEC),
        cost_estimate=pl.CostEstimate(flops=6 * n_steps, transcendentals=0,
                                      bytes_accessed=4 * (3 * n_steps + 2)),
    )

    @jax.jit
    def run(k0, reals, fakes):
        k0 = jnp.asarray(k0, jnp.float32).reshape((1,))
        reals = jnp.asarray(reals, jnp.float32)
        fakes = jnp.asarray(fakes, jnp.float32)
        k_out, convs = call(k0, reals, fakes)
        return k_out[0], convs

    return run


class BEGANRecorderPallas:
    """JAX/Pallas port of BEGANRecorder.

    `k` is functional state.  Use `.step(k, real, fake, update_k)` for a single
    on-device step, or `.run_sequence(k, reals, fakes)` to run the whole
    recurrence in ONE kernel launch.  `__call__` keeps the stateful
    nn.Module-style convenience API with `self.k` as a device array.
    """

    def __init__(self, lambda_k, init_k, gamma):
        self.lambda_k = float(lambda_k)
        self.init_k = float(init_k)
        self.gamma = float(gamma)
        # deterministic parameter init, same as nn.Parameter(torch.tensor(init_k))
        self.k = jnp.asarray(init_k, dtype=jnp.float32)
        self._steps = {}  # bool(update_k) -> jitted single-step fn
        self._seqs = {}   # (n_steps, bool(update_k)) -> jitted sequence fn

    def _get_step(self, update_k):
        update_k = bool(update_k)
        if update_k not in self._steps:
            self._steps[update_k] = _make_began_step(
                self.lambda_k, self.gamma, update_k)
        return self._steps[update_k]

    def _get_seq(self, n_steps, update_k):
        key = (int(n_steps), bool(update_k))
        if key not in self._seqs:
            self._seqs[key] = _make_began_sequence(
                self.lambda_k, self.gamma, key[1], key[0])
        return self._seqs[key]

    # Pure functional single step (caller carries k).  update_k must be a
    # Python bool (static); this selects one of two cached compiled variants.
    def step(self, k, real_dloss, fake_dloss, update_k=False):
        return self._get_step(update_k)(k, real_dloss, fake_dloss)

    # Pure functional multi-step recurrence: one kernel launch for all steps.
    def run_sequence(self, k, real_dlosses, fake_dlosses, update_k=True):
        n_steps = int(real_dlosses.shape[0])
        return self._get_seq(n_steps, update_k)(k, real_dlosses, fake_dlosses)

    # Stateful convenience form mirroring the torch module.
    def __call__(self, real_dloss, fake_dloss, update_k=False):
        new_k, convergence = self.step(self.k, real_dloss, fake_dloss, update_k)
        self.k = new_k
        # torch returns (self.k.item(), convergence); device scalars are
        # returned here to avoid forcing a host sync.
        return new_k, convergence


if __name__ == "__main__":
    key = jax.random.PRNGKey(0)
    k_real, k_fake, k_seq = jax.random.split(key, 3)

    lambda_k, init_k, gamma = 0.001, 0.0, 0.5
    recorder = BEGANRecorderPallas(lambda_k=lambda_k, init_k=init_k, gamma=gamma)

    # Scalar example "losses", as the module implies.
    real_dloss = jnp.abs(jax.random.normal(k_real, ())).astype(jnp.float32)
    fake_dloss = jnp.abs(jax.random.normal(k_fake, ())).astype(jnp.float32)

    # Forward without k update, then with k update.
    k_val, conv = recorder(real_dloss, fake_dloss, update_k=False)
    k_val2, conv2 = recorder(real_dloss, fake_dloss, update_k=True)
    jax.block_until_ready((k_val, conv, k_val2, conv2))

    # Reference check (plain python math).
    diff = gamma * float(real_dloss) - float(fake_dloss)
    conv_ref = float(real_dloss) + abs(diff)
    k_ref = min(max(init_k + lambda_k * diff, 0.0), 1.0)
    assert abs(float(conv) - conv_ref) < 1e-6
    assert abs(float(conv2) - conv_ref) < 1e-6
    assert abs(float(k_val) - init_k) < 1e-6
    assert abs(float(k_val2) - k_ref) < 1e-6
    assert abs(float(recorder.k) - k_ref) < 1e-6

    # Multi-step recurrence: 8 steps in a SINGLE kernel launch (replaces the
    # old lax.scan of per-step pallas_calls).
    n_steps = 8
    reals = jnp.abs(jax.random.normal(k_seq, (n_steps,))).astype(jnp.float32)
    fakes = jnp.abs(
        jax.random.normal(jax.random.fold_in(k_seq, 1), (n_steps,))
    ).astype(jnp.float32)

    k_final, convs = recorder.run_sequence(
        jnp.float32(init_k), reals, fakes, update_k=True)
    jax.block_until_ready((k_final, convs))

    # Pure-python reference for the in-kernel recurrence.
    k_host = init_k
    convs_host = []
    for r, f in zip(list(reals), list(fakes)):
        d = gamma * float(r) - float(f)
        convs_host.append(float(r) + abs(d))
        k_host = min(max(k_host + lambda_k * d, 0.0), 1.0)
    assert abs(float(k_final) - k_host) < 1e-5
    for a, b in zip(list(convs), convs_host):
        assert abs(float(a) - b) < 1e-5

    print("KERNEL_OK")
</pallas_src>

<mosaic_0001>
module attributes {stable_mosaic.version = 11 : i64} {
  func.func @_began_step_kernel(%arg0: memref<3xf32, #tpu.memory_space<smem>>, %arg1: memref<2xf32, #tpu.memory_space<smem>>) attributes {dimension_semantics = [], scalar_prefetch = 0 : i64, scratch_operands = 0 : i64, tpu.core_type = #tpu.core_type<tc>} {
    %c0 = arith.constant 0 : index
    %0 = memref.load %arg0[%c0] : memref<3xf32, #tpu.memory_space<smem>>
    %c1 = arith.constant 1 : index
    %1 = memref.load %arg0[%c1] : memref<3xf32, #tpu.memory_space<smem>>
    %c2 = arith.constant 2 : index
    %2 = memref.load %arg0[%c2] : memref<3xf32, #tpu.memory_space<smem>>
    %cst = arith.constant 5.000000e-01 : f32
    %3 = arith.mulf %cst, %1 : f32
    %4 = arith.subf %3, %2 : f32
    %5 = math.absf %4 : f32
    %6 = arith.addf %1, %5 : f32
    %c0_0 = arith.constant 0 : index
    %7 = memref.load %arg1[%c0_0] : memref<2xf32, #tpu.memory_space<smem>>
    memref.store %0, %arg1[%c0_0] : memref<2xf32, #tpu.memory_space<smem>>
    %c1_1 = arith.constant 1 : index
    %8 = memref.load %arg1[%c1_1] : memref<2xf32, #tpu.memory_space<smem>>
    memref.store %6, %arg1[%c1_1] : memref<2xf32, #tpu.memory_space<smem>>
    return
  }
}

</mosaic_0001>

<bundles_post_ra>
// kernel: step.1
= control target key start
LH: loop header
LB: loop body
LE: loop exit
PB: predicated region body
PF: predicated region fallthrough
CT: control target
= control target key end

     0   :  { %6 = vsyncpa [#allocation3], 0  ;;  %s99_s0 = inlined_call_operand.vmem [shape: f32[3], index: 0, kind: input, shape index: {}]   ;;  %s100_s1 = inlined_call_operand.vmem [shape: f32[2], index: 1, kind: output, shape index: {}]  }
   0x1   :  { %7 = vsyncpa [#allocation4], 0  ;;  %s14_s8 = sshll.u32 %s99_s0, 4  ;;  %s15_s8 = int_to_ptr.vmem [resolvable:$true] %s14_s8 }
   0x2   :  { %s53_s9 = scalar_lea.vmem %s15_s8, 16  ;;  %p58_p1 = scmp.lt.s32.totalorder %s15_s8, %s15_s8 }
   0x3   :  { %p54_p0 = scmp.ne.s32.totalorder %s15_s8, %s53_s9  ;;  %p59_p2 = scmp.lt.s32.totalorder %s53_s9, %s53_s9 }
   0x5   :  { %p60_p3 = por %p59_p2, %p58_p1 }
   0x7   :  { %p61_p4 = pnand %p60_p3, %p54_p0 }
   0x9   :  { %64 = shalt.err (!%p61_p4)
}
   0xa   :  { %s81_s10 = smov [#allocation2]  }
   0xb   :  { %17 = dma.vmem_to_smem %s15_s8, 16, %s81_s10, [#allocation3]  }
   0xc   :  { %77 = dma.done.wait [#allocation3], 16  }
   0xd   :  { %78 = vsyncadd [#allocation3], 4294967280 }
   0xe   :  { %21 = sfence }
   0xf   :  { %s22_s11 = sld [smem:[#allocation2]]  ;;  %s49_s12 = sld [smem:[#allocation2 + $0x1]] }
  0x10   :  { %s50_s13 = sld [smem:[#allocation2 + $0x2]]  ;;  %s39_s16 = sshll.u32 %s100_s1, 4  ;;  %s40_s16 = int_to_ptr.vmem [resolvable:$true] %s39_s16 }
  0x11   :  { %s65_s20 = scalar_lea.vmem %s40_s16, 16  ;;  %p70_p6 = scmp.lt.s32.totalorder %s40_s16, %s40_s16 }
  0x12   :  { %p66_p5 = scmp.ne.s32.totalorder %s40_s16, %s65_s20  ;;  %p71_p7 = scmp.lt.s32.totalorder %s65_s20, %s65_s20 }
  0x14   :  { %p72_p8 = por %p71_p7, %p70_p6 }
  0x15   :  { %s25_s14 = smul.f32 0.5, %s49_s12  ;;  %30 = sst [smem:[#allocation5]] %s22_s11 }
  0x16   :  { %p73_p9 = pnand %p72_p8, %p66_p5 }
  0x17   :  { %s26_s17 = ssub.f32 %s25_s14, %s50_s13 }
  0x19   :  { %s27_s18 = sand.u32 2147483647, %s26_s17 }
  0x1a   :  { %s28_s19 = sadd.f32 %s49_s12, %s27_s18 }
  0x1c   :  { %32 = sst [smem:[#allocation5 + $0x1]] %s28_s19 }
  0x1d   :  { %76 = shalt.err (!%p73_p9)
}
  0x1e   :  { %s82_s21 = smov [#allocation5]  }
  0x1f   :  { %42 = dma.smem_to_vmem %s82_s21, 16, %s40_s16, [#allocation4]  }
  0x20   :  { %79 = dma.done.wait [#allocation4], 16  }
  0x21   :  { %80 = vsyncadd [#allocation4], 4294967280 }
  0x22   :  { %46 = sfence }
  0x23   :  { %47 = vsyncpa [#allocation3], 1 }
  0x24   :  { %48 = vsyncpa [#allocation4], 1 }

</bundles_post_ra>
